<compile_context>
chip_gen: v7x
topology: tpu7x:2x2x1
jax: 0.10.0
libtpu: 0.0.40
codegen_flags: <defaults>
</compile_context>

<pallas_src>
import functools

import jax
import jax.numpy as jnp
from jax.experimental import pallas as pl
from jax.experimental.pallas import tpu as pltpu


def _round_up(v: int, m: int) -> int:
    return ((v + m - 1) // m) * m


def _round_down(v: int, m: int) -> int:
    return (v // m) * m


def _vmem_limit_bytes() -> int:
    """Scoped-VMEM limit with headroom under the chip's physical VMEM."""
    cap = 64 * 1024 * 1024  # v7x per-TensorCore VMEM (smallest of v5e/v6e/v7x)
    try:
        info = pltpu.get_tpu_info()
        cap = int(getattr(info, "vmem_capacity_bytes", cap) or cap)
    except Exception:
        pass
    return min(cap * 3 // 4, 64 * 1024 * 1024)  # 48 MiB on v7x, 64 MiB on v5e/v6e


def _perceptron_kernel(x_ref, w_ref, b_ref, o_ref, acc_ref, *, nk, dk, d_rem):
    # x_ref: (TB, DK) VMEM; w_ref: (1, DK) VMEM; b_ref: (1,) SMEM
    # o_ref: (1, 1, TB) VMEM (lane-dense); acc_ref: (1, TB) f32 VMEM
    k = pl.program_id(1)

    @pl.when(k == 0)
    def _init():
        acc_ref[...] = jnp.zeros_like(acc_ref)

    x = x_ref[...].astype(jnp.float32)      # upcast (bf16 path) — f32 math throughout
    w = w_ref[...].astype(jnp.float32)
    if d_rem:
        # Last D block is partial: zero padded lanes (OOB reads are garbage and
        # would contaminate the contraction).
        lane = jax.lax.broadcasted_iota(jnp.int32, (1, dk), 1)
        valid = lane < jnp.where(k == nk - 1, d_rem, dk)
        w = jnp.where(valid, w, 0.0)
        x = jnp.where(valid, x, 0.0)

    # (1, DK) x (TB, DK) contracting DK -> lane-dense (1, TB) partial logits.
    acc_ref[...] += jax.lax.dot_general(
        w, x,
        dimension_numbers=(((1,), (1,)), ((), ())),
        preferred_element_type=jnp.float32,
        precision=jax.lax.Precision.HIGHEST,
    )

    @pl.when(k == nk - 1)
    def _finalize():
        logits = acc_ref[...] + b_ref[0]                    # scalar bias from SMEM
        o_ref[...] = jax.nn.sigmoid(logits)[None].astype(o_ref.dtype)


def perceptron_forward(x, weight, bias, *, max_tile_bytes=8 * 1024 * 1024,
                       min_pallas_dim=128):
    """sigmoid(x @ weight.T + bias).  x: [B, D]; weight: [1, D]; bias: [1] -> [B, 1]."""
    B, D = x.shape
    w = weight.reshape(1, D)
    b = bias.reshape(1).astype(jnp.float32)

    if D < min_pallas_dim:
        # Lane padding would waste >= 128/D of VMEM and load bandwidth; let XLA do it.
        logits = jnp.sum(x.astype(jnp.float32) * w.astype(jnp.float32),
                         axis=-1, keepdims=True) + b
        return jax.nn.sigmoid(logits).astype(x.dtype)

    itemsize = x.dtype.itemsize
    sub = max(8, 32 // itemsize)            # sublane granule: 8 (f32), 16 (bf16)

    # ---- batch tile sized by bytes ---------------------------------------
    row_bytes = D * itemsize
    tb = _round_down(max_tile_bytes // row_bytes, sub)
    tb = max(sub, min(tb, _round_up(B, sub)))
    # Megacore: give the "parallel" batch axis at least 2 steps when B allows.
    if pl.cdiv(B, tb) < 2 and B >= 2 * sub:
        tb = _round_up(pl.cdiv(B, 2), sub)
    nb = pl.cdiv(B, tb)

    # ---- D reduction split (only when a single x block would be too big) --
    x_block_bytes = tb * row_bytes
    if x_block_bytes > max_tile_bytes and D > 128:
        dk = min(D, max(128, _round_down(max_tile_bytes // (tb * itemsize), 128)))
    else:
        dk = D
    nk = pl.cdiv(D, dk)
    d_rem = D % dk

    kernel = functools.partial(_perceptron_kernel, nk=nk, dk=dk, d_rem=d_rem)

    cost = pl.CostEstimate(
        flops=2 * B * D,
        transcendentals=B,                                   # one sigmoid per row
        bytes_accessed=(itemsize * B * D                     # x streamed once
                        + nb * D * w.dtype.itemsize          # w revisited per batch tile
                        + 4                                  # bias
                        + itemsize * nb * tb),               # output slab
    )

    out = pl.pallas_call(
        kernel,
        out_shape=jax.ShapeDtypeStruct((nb, 1, tb), x.dtype),
        grid_spec=pltpu.PrefetchScalarGridSpec(
            num_scalar_prefetch=0,
            grid=(nb, nk),
            in_specs=[
                pl.BlockSpec((tb, dk), lambda i, k: (i, k)),         # x tile
                pl.BlockSpec((1, dk), lambda i, k: (0, k)),          # weight block
                pl.BlockSpec(memory_space=pltpu.MemorySpace.SMEM),   # bias scalar
            ],
            out_specs=pl.BlockSpec((1, 1, tb), lambda i, k: (i, 0, 0)),
            scratch_shapes=[pltpu.VMEM((1, tb), jnp.float32)],       # logit accumulator
        ),
        compiler_params=pltpu.CompilerParams(
            dimension_semantics=("parallel", "arbitrary"),   # batch tiles across TCs
            vmem_limit_bytes=_vmem_limit_bytes(),
        ),
        cost_estimate=cost,
    )(x, w, b)

    # (nb, 1, tb) lane-dense slab -> (B, 1); rows beyond B are padding, drop them.
    return out.reshape(nb * tb)[:B].reshape(B, 1)


if __name__ == "__main__":
    key = jax.random.PRNGKey(0)

    def make_case(case_key, batch, dimension, dtype):
        kx, kw, kb = jax.random.split(case_key, 3)
        bound = 1.0 / (dimension ** 0.5)     # nn.Linear default init range
        x = jax.random.normal(kx, (batch, dimension), dtype=jnp.float32)
        weight = jax.random.uniform(kw, (1, dimension), jnp.float32, -bound, bound)
        bias = jax.random.uniform(kb, (1,), jnp.float32, -bound, bound)
        return x.astype(dtype), weight, bias

    def reference(x, weight, bias):
        xf = x.astype(jnp.float32)
        wf = weight.astype(jnp.float32).reshape(1, -1)
        logits = jnp.sum(xf * wf, axis=-1, keepdims=True) + bias.astype(jnp.float32)
        return jax.nn.sigmoid(logits)

    cases = [
        # (batch, dim, dtype, kwargs, atol)
        (16, 128, jnp.float32, {}, 1e-5),                        # small, 2 batch tiles
        (24, 512, jnp.float32, {}, 1e-5),                        # B not a multiple of TB
        (32, 256, jnp.bfloat16, {}, 1e-2),                       # bf16 streaming path
        (16, 320, jnp.float32, {"max_tile_bytes": 4096}, 1e-5),  # forced D split + mask
    ]

    for case_key, (batch, dim, dtype, kwargs, atol) in zip(
            jax.random.split(key, len(cases)), cases):
        x, weight, bias = make_case(case_key, batch, dim, dtype)
        out = jax.block_until_ready(perceptron_forward(x, weight, bias, **kwargs))
        ref = reference(x, weight, bias)
        assert out.shape == (batch, 1), (batch, dim, out.shape)
        assert out.dtype == x.dtype, (dtype, out.dtype)
        err = jnp.max(jnp.abs(out.astype(jnp.float32) - ref))
        assert jnp.allclose(out.astype(jnp.float32), ref, atol=atol, rtol=1e-3), (
            batch, dim, dtype, float(err))

    print("KERNEL_OK")
</pallas_src>

<mosaic_0001>
module attributes {stable_mosaic.version = 11 : i64} {
  func.func @_perceptron_kernel(%arg0: i32, %arg1: i32, %arg2: memref<8x128xf32, #tpu.memory_space<vmem>>, %arg3: memref<1x128xf32, #tpu.memory_space<vmem>>, %arg4: memref<1xf32, #tpu.memory_space<smem>>, %arg5: memref<1x1x8xf32, #tpu.memory_space<vmem>>, %arg6: memref<1x8xf32, #tpu.memory_space<vmem>>) attributes {dimension_semantics = [#tpu.dimension_semantics<parallel>, #tpu.dimension_semantics<arbitrary>], iteration_bounds = array<i64: 2, 1>, scalar_prefetch = 0 : i64, scratch_operands = 1 : i64, tpu.core_type = #tpu.core_type<tc>, window_params = [{transform_indices = @transform_0, window_bounds = array<i64: 8, 128>}, {transform_indices = @transform_1, window_bounds = array<i64: 1, 128>}, {transform_indices = @transform_2, window_bounds = array<i64: 1>}, {transform_indices = @transform_3, window_bounds = array<i64: 1, 1, 8>}]} {
    %c0_i32 = arith.constant 0 : i32
    %0 = arith.cmpi eq, %arg1, %c0_i32 : i32
    %1 = arith.extui %0 : i1 to i32
    %c0_i32_0 = arith.constant 0 : i32
    %2 = arith.cmpi ne, %1, %c0_i32_0 : i32
    scf.if %2 {
      %cst_10 = arith.constant 0.000000e+00 : f32
      %12 = vector.broadcast %cst_10 : f32 to vector<1x8xf32>
      %c0_11 = arith.constant 0 : index
      %c0_12 = arith.constant 0 : index
      %13 = vector.load %arg6[%c0_11, %c0_12] : memref<1x8xf32, #tpu.memory_space<vmem>>, vector<1x8xf32>
      tpu.vector_store %arg6[%c0_11, %c0_12], %12 {strides = array<i32>} : memref<1x8xf32, #tpu.memory_space<vmem>>, vector<1x8xf32>,
    } else {
    }
    %c0 = arith.constant 0 : index
    %c0_1 = arith.constant 0 : index
    %3 = vector.load %arg2[%c0, %c0_1] : memref<8x128xf32, #tpu.memory_space<vmem>>, vector<8x128xf32>
    %c0_2 = arith.constant 0 : index
    %c0_3 = arith.constant 0 : index
    %4 = vector.load %arg3[%c0_2, %c0_3] : memref<1x128xf32, #tpu.memory_space<vmem>>, vector<1x128xf32>
    %c0_4 = arith.constant 0 : index
    %c0_5 = arith.constant 0 : index
    %5 = vector.load %arg6[%c0_4, %c0_5] : memref<1x8xf32, #tpu.memory_space<vmem>>, vector<1x8xf32>
    %cst = arith.constant dense<0.000000e+00> : vector<1x8xf32>
    %6 = tpu.matmul %4, %3, %cst {dimension_numbers = #tpu.dot_dimension_numbers<[1], [1], [0], [0], [0, 0, 1, 0], [], []>, precision = #tpu.contract_precision<fp32>} : vector<1x128xf32>, vector<8x128xf32>, vector<1x8xf32> -> vector<1x8xf32>
    %7 = arith.addf %5, %6 : vector<1x8xf32>
    %c0_6 = arith.constant 0 : index
    %c0_7 = arith.constant 0 : index
    %8 = vector.load %arg6[%c0_6, %c0_7] : memref<1x8xf32, #tpu.memory_space<vmem>>, vector<1x8xf32>
    tpu.vector_store %arg6[%c0_6, %c0_7], %7 {strides = array<i32>} : memref<1x8xf32, #tpu.memory_space<vmem>>, vector<1x8xf32>,
    %c0_i32_8 = arith.constant 0 : i32
    %9 = arith.cmpi eq, %arg1, %c0_i32_8 : i32
    %10 = arith.extui %9 : i1 to i32
    %c0_i32_9 = arith.constant 0 : i32
    %11 = arith.cmpi ne, %10, %c0_i32_9 : i32
    scf.if %11 {
      %c0_10 = arith.constant 0 : index
      %c0_11 = arith.constant 0 : index
      %12 = vector.load %arg6[%c0_10, %c0_11] : memref<1x8xf32, #tpu.memory_space<vmem>>, vector<1x8xf32>
      %c0_12 = arith.constant 0 : index
      %13 = memref.load %arg4[%c0_12] : memref<1xf32, #tpu.memory_space<smem>>
      %14 = vector.broadcast %13 : f32 to vector<1x8xf32>
      %15 = arith.addf %12, %14 : vector<1x8xf32>
      %16 = arith.negf %15 : vector<1x8xf32>
      %17 = math.exp %16 : vector<1x8xf32>
      %cst_13 = arith.constant 1.000000e+00 : f32
      %18 = vector.broadcast %cst_13 : f32 to vector<1x8xf32>
      %19 = arith.addf %18, %17 : vector<1x8xf32>
      %20 = arith.divf %18, %19 : vector<1x8xf32>
      %21 = vector.shape_cast %20 : vector<1x8xf32> to vector<1x1x8xf32>
      %c0_14 = arith.constant 0 : index
      %c0_15 = arith.constant 0 : index
      %c0_16 = arith.constant 0 : index
      %22 = vector.load %arg5[%c0_14, %c0_15, %c0_16] : memref<1x1x8xf32, #tpu.memory_space<vmem>>, vector<1x1x8xf32>
      tpu.vector_store %arg5[%c0_14, %c0_15, %c0_16], %21 {strides = array<i32>} : memref<1x1x8xf32, #tpu.memory_space<vmem>>, vector<1x1x8xf32>,
    } else {
    }
    return
  }
  func.func @transform_0(%arg0: i32, %arg1: i32) -> (i32, i32) {
    %c0_i32 = arith.constant 0 : i32
    return %arg0, %arg1 : i32, i32
  }
  func.func @transform_1(%arg0: i32, %arg1: i32) -> (i32, i32) {
    %c0_i32 = arith.constant 0 : i32
    %c0_i32_0 = arith.constant 0 : i32
    return %c0_i32, %arg1 : i32, i32
  }
  func.func @transform_2(%arg0: i32, %arg1: i32) -> i32 {
    %c0_i32 = arith.constant 0 : i32
    %c0_i32_0 = arith.constant 0 : i32
    return %c0_i32 : i32
  }
  func.func @transform_3(%arg0: i32, %arg1: i32) -> (i32, i32, i32) {
    %c0_i32 = arith.constant 0 : i32
    %c0_i32_0 = arith.constant 0 : i32
    %c0_i32_1 = arith.constant 0 : i32
    return %arg0, %c0_i32, %c0_i32_0 : i32, i32, i32
  }
}

</mosaic_0001>

<bundles_post_ra>
// kernel: tpu_custom_call.1
= control target key start
LH: loop header
LB: loop body
LE: loop exit
PB: predicated region body
PF: predicated region fallthrough
CT: control target
= control target key end

     0   :  { %s1236_s0 = inlined_call_operand.hbm [shape: f32[16,128], index: 0, kind: input, shape index: {}]   ;;  %s1237_s1 = inlined_call_operand.vmem [shape: f32[1,128], index: 1, kind: input, shape index: {}]   ;;  %s1238_s2 = inlined_call_operand.<no memory space> [shape: f32[1], index: 2, kind: input, shape index: {}]   ;;  %s1239_s3 = inlined_call_operand.hbm [shape: f32[2,1,8], index: 3, kind: output, shape index: {}]  }
   0x1   :  { %8 = sst [smem:[#allocation3]] %s1238_s2 }
   0x2   :  { %9 = vsyncpa [#allocation5], 0 }
   0x3   :  { %11 = vsyncpa [#allocation5 + $0x1], 0 }
   0x4   :  { %12 = vsyncpa [#allocation6], 0 }
   0x5   :  { %14 = vsyncpa [#allocation6 + $0x1], 0  ;;  %s1051_s14 = smov 0   ;;  %s1053_s15 = smov 0  }
   0x6   :  { %s1055_s16 = smov 0   ;;  %s1057_s17 = smov 0  }
   0x7   :  { %s1059_s18 = smov 0   ;;  %s1061_s19 = smov 0  }
   0x8 LB: > { %s787_s2 = sadd.s32 4294967295, %s1022_s19   ;;  %s788_s20 = sadd.s32 4294967294, %s1022_s19   ;;  %s1022_s19 = sphi %s1061_s19, %s20_s19   ;;  %s1018_s18 = sphi %s1059_s18, %s1255_s18   ;;  %s1014_s17 = sphi %s1057_s17, %s1254_s17   ;;  %s1010_s16 = sphi %s1055_s16, %s1253_s16   ;;  %s1006_s15 = sphi %s1053_s15, %s1252_s15   ;;  %s1002_s14 = sphi %s1051_s14, %s1251_s14  }
   0x9   : > { %s32_s21 = sadd.s32 1, %s1018_s18  ;;  %s41_s22 = sadd.s32 1, %s1010_s16 }
   0xa   : > { %p34_p0 = scmp.ge.s32.totalorder %s32_s21, 2  ;;  %p48_p1 = scmp.ne.s32.totalorder %s1010_s16, %s1006_s15 }
   0xb   : > { %p49_p2 = scmp.eq.s32.totalorder %s1022_s19, 0  ;;  %p54_p3 = scmp.ne.s32.totalorder %s1006_s15, %s1002_s14 }
   0xc   : > { %s1257_s21 = smov (%p34_p0, %s32_s21), 0  ;;  %p55_p5 = scmp.eq.s32.totalorder %s787_s2, 0 }
   0xd   : > { %p1092_p4 = por %p49_p2, %p48_p1  ;;  %s36_s24 = ssub.s32 %s1018_s18, %s1257_s21 }
   0xe   : > { %p125_p6 = scmp.eq.s32.totalorder %s787_s2, 1  ;;  %p39_p7 = scmp.eq.s32.totalorder %s36_s24, 0 }
   0xf   : > { %p1098_p8 = por %p55_p5, %p54_p3  ;;  %p131_p10 = scmp.eq.s32.totalorder %s788_s20, 1 }
  0x10   : > { %p1102_p9 = por %p125_p6, %p48_p1  ;;  %p854_p13 = scmp.lt.s32.totalorder %s1022_s19, 2 }
  0x11   : > { %s1107_s27 = scalar_select %p39_p7, %s1010_s16, %s41_s22  }
  0x12   : > { %s1243_s26 = scalar_select %p1102_p9, 1, 0 }
  0x13   : > { %p1109_p11 = por %p131_p10, %p54_p3  ;;  %s160_s29 = sand.u32 1, %s1010_s16  }
  0x14   : > { %s792_s30 = sshll.u32 %s160_s29, 3  ;;  %s793_s4 = sshll.u32 %s1018_s18, 7 }
  0x15   : > { %s1244_s28 = scalar_select %p1109_p11, 1, 0 }
  0x16   : > { %s1120_s7 = scalar_lea.hbm %s1236_s0, %s793_s4  ;;  %s164_s8 = scalar_lea.vmem [#allocation4], %s792_s30 }
  0x17   : > { %s172_s9 = sshll.u32 %s164_s8, 4  ;;  %p1126_p0 = pnand %p854_p13, %p1092_p4  ;;  %s1122_s9 = int_to_ptr.vmem [resolvable:$true] %s172_s9 }
  0x18   : > { %s161_s11 = scalar_lea.sflag [#allocation5], %s160_s29  ;;  %s910_s12 = scalar_lea.hbm %s1120_s7, 128 }
  0x19   : > { %p911_p3 = scmp.ne.s32.totalorder %s1120_s7, %s910_s12  ;;  %p912_p5 = pneg %p1126_p0 }
  0x1a   : > { %s915_s20 = scalar_lea.hbm %s1236_s0, 256  ;;  %p916_p4 = scmp.lt.u32.totalorder %s1120_s7, %s1236_s0 }
  0x1b   : > { %p913_p6 = pnand %p912_p5, %p911_p3  ;;  %p917_p10 = scmp.lt.u32.totalorder %s915_s20, %s910_s12 }
  0x1c   : > { %p919_p12 = scmp.lt.u32.totalorder %s910_s12, %s1120_s7 }
  0x1d   : > { %p914_p7 = pneg %p913_p6  ;;  %p918_p13 = por %p917_p10, %p916_p4 }
  0x1f   : > { %p920_p1 = por %p919_p12, %p918_p13 }
  0x21   : > { %p921_p2 = pnand %p920_p1, %p914_p7 }
  0x23   : > { %924 = shalt.err (!%p921_p2)
}
  0x24   : > { %s925_s24 = scalar_lea.vmem %s1122_s9, 128  ;;  %s1024_s29 = smov [#allocation4]  }
  0x25   : > { %p926_p3 = scmp.ne.s32.totalorder %s1122_s9, %s925_s24  ;;  %s930_s30 = sshll.u32 %s1024_s29, 4  ;;  %s931_s30 = int_to_ptr.vmem [resolvable:$false] %s930_s30 }
  0x26   : > { %s932_s4 = scalar_lea.vmem %s931_s30, 256  ;;  %p933_p9 = scmp.lt.s32.totalorder %s1122_s9, %s931_s30 }
  0x27   : > { %p928_p6 = pnand %p926_p3, %p912_p5  ;;  %p934_p4 = scmp.lt.s32.totalorder %s932_s4, %s925_s24 }
  0x29   : > { %p929_p11 = pneg %p928_p6  ;;  %p935_p10 = por %p934_p4, %p933_p9 }
  0x2b   : > { %p936_p12 = pnand %p935_p10, %p929_p11 }
  0x2d   : > { %939 = shalt.err (!%p936_p12)
}
  0x2e   : > { %849 = dma.hbm_to_vmem [thread:$0]  (!%p1126_p0), %s1120_s7, 128, %s1122_s9, %s161_s11  }
  0x2f   : > { %p1246_p1 = scmp.lt.s32.totalorder %s1022_s19, 3  ;;  %p1247_p2 = scmp.ge.s32.totalorder %s1022_s19, 1 }
  0x31   : > { %p178_p5 = pnand %p1247_p2, %p1246_p1 }
  0x32   : > { %s1162_s5 = sand.u32 (!%p178_p5), 1, %s1006_s15  }
  0x33   : > { %181 = sbr.rel (%p178_p5) target bundleno = 347 (0x15b), region = 32  ;;  %s795_s6 = sshll.u32 (!%p178_p5), %s1162_s5, 3 }
  0x34   : > { %s184_s8 = scalar_lea.sflag (!%p178_p5), [#allocation5], %s1162_s5  ;;  %s187_s12 = scalar_lea.vmem (!%p178_p5), [#allocation4], %s795_s6 }
  0x3a   : > { %993 = dma.done.wait (%p1098_p8), %s184_s8, 128  }
  0x3b   : > { %995 = vsyncadd (%p1098_p8), %s184_s8, 4294967168  ;;  %v1025_v0 = vmov 0.0   ;;  %vm1026_vm0 = vmmov 0   ;;  %v221_v1 = vld [vmem:[%s187_s12] sm:$0xff]  ;;  %v222_v2 = vld [vmem:[%s1237_s1] sm:$0x1] }
  0x3c   : > { %812 = vmatprep.subr.mxu0 %v1025_v0  ;;  %817 = vmatprep.subr.mxu1 %v1025_v0  ;;  %v225_v3 = vand.u32 4294901760, %v221_v1  ;;  %v290_v4 = vand.u32 4294901760, %v222_v2  ;;  %vm219_vm1 = vcmask 57344   ;;  %s677_s25 = sld [smem:[#allocation3]]  ;;  %s797_s10 = sshll.u32 %s1014_s17, 4 }
  0x3d   : > { %814 = vmatprep.mubr.msk.f32.mxu0 %vm1026_vm0, %v1025_v0  ;;  %819 = vmatprep.mubr.msk.f32.mxu1 %vm1026_vm0, %v1025_v0  ;;  %220 = vst.msk [vmem:[#allocation2] sm:$0x1] %vm219_vm1, %v1025_v0  ;;  %s211_s11 = scalar_lea.vmem [#allocation7], %s1162_s5  ;;  %s1186_s22 = scalar_lea.hbm %s1239_s3, %s797_s10 }
  0x3e   : > { %813 = vmatpush3.xpose.msra.mxu0 %v225_v3  ;;  %v302_v5 = vsub.f32 %v221_v1, %v225_v3  ;;  %v291_v6 = vsub.f32 %v222_v2, %v290_v4  ;;  %s700_s13 = sshll.u32 %s211_s11, 4  ;;  %s688_s23 = scalar_lea.sflag [#allocation6], %s1162_s5  ;;  %s1188_s13 = int_to_ptr.vmem [resolvable:$true] %s700_s13 }
  0x3f   : > { %822 = vmatprep.subr.mxu0 %v1025_v0  ;;  %s940_s24 = scalar_lea.vmem %s1188_s13, 16  ;;  %p1248_p9 = scmp.ne.s32.totalorder %s1243_s26, 0 }
  0x40   : > { %v303_v7 = vand.u32 4294901760, %v302_v5  ;;  %v292_v8 = vand.u32 4294901760, %v291_v6  ;;  %p941_p8 = scmp.ne.s32.totalorder %s1188_s13, %s940_s24  ;;  %s1027_s17 = smov [#allocation7]  }
  0x41   : > { %s944_s29 = sshll.u32 %s1027_s17, 4  ;;  %s945_s29 = int_to_ptr.vmem [resolvable:$false] %s944_s29 }
  0x42   : > { %v304_v9 = vsub.f32 %v302_v5, %v303_v7  ;;  %v293_v10 = vsub.f32 %v291_v6, %v292_v8  ;;  %v678_v32 = vstv %s677_s25  ;;  %p942_p11 = pnand %p941_p8, %p1248_p9  ;;  %s946_s30 = scalar_lea.vmem %s945_s29, 32 }
  0x43   : > { %p947_p7 = scmp.lt.s32.totalorder %s1188_s13, %s945_s29  ;;  %p948_p13 = scmp.lt.s32.totalorder %s946_s30, %s940_s24 }
  0x44   : > { %v305_v11 = vand.u32 4294901760, %v304_v9  ;;  %v294_v12 = vand.u32 4294901760, %v293_v10  ;;  %v223_v27 = vld [vmem:[#allocation2] sm:$0x1]  ;;  %p943_p0 = pneg %p942_p11 }
  0x45   : > { %p949_p3 = por %p948_p13, %p947_p7 }
  0x46   : > { %818 = vmatpush3.xpose.msra.mxu1 %v305_v11  ;;  %815 = vmatmul.mubr.f32.vlgmr.msra.gmra.mrb[0].mxu0 %v294_v12 }
  0x47   : > { %823 = vmatpush3.xpose.msra.mxu0 %v302_v5  ;;  %827 = vmatprep.subr.mxu1 %v1025_v0  ;;  %p950_p6 = pnand %p949_p3, %p943_p0 }
  0x48   : > { %824 = vmatprep.mubr.msk.f32.mxu0 %vm1026_vm0, %v1025_v0  ;;  %832 = vmatprep.subr.mxu0 %v1025_v0 }
  0x49   : > { %820 = vmatmul.mubr.f32.vlgmr.msra.gmra.mrb[0].mxu1 %v290_v4 }
  0x4a   : > { %828 = vmatpush3.xpose.msra.mxu1 %v225_v3  ;;  %825 = vmatmul.mubr.f32.vlgmr.msra.gmra.mrb[2].mxu0 %v291_v6 }
  0x4b   : > { %829 = vmatprep.mubr.msk.f32.mxu1 %vm1026_vm0, %v1025_v0  ;;  %833 = vmatpush3.xpose.msra.mxu0 %v303_v7 }
  0x4c   : > { %837 = vmatprep.subr.mxu1 %v1025_v0  ;;  %834 = vmatprep.mubr.msk.f32.mxu0 %vm1026_vm0, %v1025_v0 }
  0x4d   : > { %830 = vmatmul.mubr.f32.vlgmr.msra.gmra.mrb[2].mxu1 %v292_v8 }
  0x4e   : > { %838 = vmatpush3.xpose.msra.mxu1 %v225_v3  ;;  %835 = vmatmul.mubr.f32.vlgmr.msra.gmra.mrb[4].mxu0 %v290_v4 }
  0x4f   : > { %839 = vmatprep.mubr.msk.f32.mxu1 %vm1026_vm0, %v1025_v0 }
  0x51   : > { %840 = vmatmul.mubr.f32.vlgmr.msra.gmra.mrb[4].mxu1 %v290_v4 }
 0x119   : > { %v296_v13 = vpop.f32.mrb[0].mxu0 }
 0x11a   : > { %v816_v14 = vpop.f32.mrb[1].mxu0 }
 0x11c   : > { %v372_v15 = vpop.f32.mrb[0].mxu1 }
 0x11d   : > { %v373_v16 = vadd.f32 %v372_v15, %v296_v13  ;;  %v821_v17 = vpop.f32.mrb[1].mxu1  ;;  %v446_v18 = vpop.f32.mrb[2].mxu0 }
 0x11e   : > { %v826_v19 = vpop.f32.mrb[3].mxu0 }
 0x11f   : > { %v447_v20 = vadd.f32 %v446_v18, %v373_v16 }
 0x120   : > { %v520_v21 = vpop.f32.mrb[2].mxu1 }
 0x121   : > { %v521_v22 = vadd.f32 %v520_v21, %v447_v20  ;;  %v831_v23 = vpop.f32.mrb[3].mxu1  ;;  %v594_v24 = vpop.f32.mrb[4].mxu0 }
 0x122   : > { %v836_v25 = vpop.f32.mrb[5].mxu0 }
 0x123   : > { %v595_v26 = vadd.f32 %v594_v24, %v521_v22 }
 0x124   : > { %v666_v28 = vpop.f32.mrb[4].mxu1 }
 0x125   : > { %v667_v29 = vadd.f32 %v666_v28, %v595_v26  ;;  %v841_v30 = vpop.f32.mrb[5].mxu1 }
 0x127   : > { %v670_v31 = vadd.f32 %v667_v29, %v223_v27 }
 0x129   : > { %672 = vst.msk [vmem:[#allocation2] sm:$0x1] %vm219_vm1, %v670_v31 }
 0x130   : > { %v676_v33 = vld [vmem:[#allocation2] sm:$0x1] }
 0x131   : > { %v679_v34 = vadd.f32 %v678_v32, %v676_v33 }
 0x133   : > { %v796_v35 = vmul.f32 -1.442695, %v679_v34 }
 0x135   : > { %906 = vpow2.f32 %v796_v35 }
 0x13f   : > { %v907_v36 = vpop.eup %906 }
 0x140   : > { %v683_v37 = vadd.f32 1.0, %v907_v36 }
 0x142   : > { %908 = vrcp.f32 %v683_v37 }
 0x14c   : > { %v909_v38 = vpop.eup %908 }
 0x14d   : > { %686 = vst.msk [vmem:[%s211_s11] sm:$0x1] %vm219_vm1, %v909_v38 }
 0x14e   : > { %953 = shalt.err (!%p950_p6)
}
 0x14f   : > { %s954_s4 = scalar_lea.hbm %s1186_s22, 16  ;;  %s958_s8 = scalar_lea.hbm %s1239_s3, 32 }
 0x150   : > { %p955_p4 = scmp.ne.s32.totalorder %s1186_s22, %s954_s4  ;;  %p959_p1 = scmp.lt.u32.totalorder %s1186_s22, %s1239_s3 }
 0x151   : > { %p960_p2 = scmp.lt.u32.totalorder %s958_s8, %s954_s4  ;;  %p962_p8 = scmp.lt.u32.totalorder %s954_s4, %s1186_s22 }
 0x152   : > { %p956_p10 = pnand %p955_p4, %p1248_p9 }
 0x153   : > { %p961_p5 = por %p960_p2, %p959_p1 }
 0x154   : > { %p957_p12 = pneg %p956_p10 }
 0x155   : > { %p963_p11 = por %p962_p8, %p961_p5 }
 0x157   : > { %p964_p0 = pnand %p963_p11, %p957_p12 }
 0x159   : > { %967 = shalt.err (!%p964_p0)
}
 0x15a   : > { %844 = dma.vmem_to_hbm [thread:$0]  (%p1248_p9), %s1188_s13, 16, %s1186_s22, %s688_s23  }
 0x15b PF: > { %s712_s9 = sand.u32 1, %s1002_s14   ;;  %p1249_p7 = scmp.ne.s32.totalorder %s1244_s28, 0 }
 0x15c   : > { %p1250_p13 = scmp.ge.s32.totalorder %s1022_s19, 2  ;;  %s713_s25 = scalar_lea.sflag [#allocation6], %s712_s9 }
 0x15e   : > { %p851_p3 = pnand %p1250_p13, %p1249_p7 }
 0x160   : > { %997 = dma.done.wait (!%p851_p3), %s713_s25, 16  }
 0x161   : > { %999 = vsyncadd (!%p851_p3), %s713_s25, 4294967280  ;;  %s20_s19 = sadd.s32 1, %s1022_s19   ;;  %s1251_s14 = smov %s1006_s15 }
 0x162   : > { %p17_p6 = scmp.ge.s32.totalorder %s20_s19, 4   ;;  %s1252_s15 = smov %s1010_s16 }
 0x163   : > { %s1253_s16 = smov %s1107_s27  ;;  %s1254_s17 = smov %s1018_s18 }
 0x164   : > { %s1255_s18 = smov %s1257_s21  ;;  %19 = sbr.rel (!%p17_p6) target bundleno = 8 (0x8), region = 88 }
 0x16b   :  { %717 = vsyncpa [#allocation5], 1 }
 0x16c   :  { %719 = vsyncpa [#allocation5 + $0x1], 1 }
 0x16d   :  { %720 = vsyncpa [#allocation6], 1 }
 0x16e   :  { %722 = vsyncpa [#allocation6 + $0x1], 1 }

</bundles_post_ra>
